<compile_context>
chip_gen: v6e
topology: v6e:2x2x1
jax: 0.10.0
libtpu: 0.0.40
codegen_flags: <defaults>
</compile_context>

<pallas_src>
import math

import jax
import jax.numpy as jnp
from jax.experimental import pallas as pl
from jax.experimental.pallas import tpu as pltpu


# ---------------------------------------------------------------------------
# PE table (matches the PyTorch buffer construction, for the first S rows).
# ---------------------------------------------------------------------------
def _pe_table(S: int, d_model: int) -> jnp.ndarray:
    assert d_model % 2 == 0, "d_model must be even (classic PE recipe)"
    position = jnp.arange(S, dtype=jnp.float32)[:, None]                      # (S, 1)
    div_term = jnp.exp(
        jnp.arange(0, d_model, 2, dtype=jnp.float32) * (-(math.log(10000.0) / d_model))
    )                                                                         # (D/2,)
    angle = position * div_term                                               # (S, D/2)
    pe = jnp.zeros((S, d_model), dtype=jnp.float32)
    pe = pe.at[:, 0::2].set(jnp.sin(angle))
    pe = pe.at[:, 1::2].set(jnp.cos(angle))
    return pe


# ---------------------------------------------------------------------------
# Kernels
# ---------------------------------------------------------------------------
def _make_kernel(use_dropout: bool, dropout_p: float):
    if use_dropout:
        # P(bits >= thr) = 1 - p  on uniform uint32 bits.
        thr = min(int(round(dropout_p * 4294967296.0)), 4294967295)
        inv_keep = 1.0 / (1.0 - dropout_p)

        def kernel(x_ref, pe_ref, bits_ref, o_ref):
            # x_ref/o_ref/bits_ref: (TB, TS, D); pe_ref: (TS, D) -> broadcast over TB.
            y = x_ref[...] + pe_ref[...]
            keep = bits_ref[...] >= jnp.uint32(thr)
            scale = jnp.asarray(inv_keep, dtype=y.dtype)
            y = y * jnp.where(keep, scale, jnp.zeros_like(scale))   # single multiply
            o_ref[...] = y.astype(o_ref.dtype)
    else:

        def kernel(x_ref, pe_ref, o_ref):
            o_ref[...] = (x_ref[...] + pe_ref[...]).astype(o_ref.dtype)

    return kernel


# ---------------------------------------------------------------------------
# Tiling: generation-derived VMEM budget, batch folding, >=2 parallel steps.
# ---------------------------------------------------------------------------
def _choose_tiles(B, S, D, itemsize, use_dropout, device_kind):
    sublane = max(8, 32 // max(1, itemsize))          # 8 f32, 16 bf16, 32 int8
    dk = device_kind.lower()
    if "v6" in dk or "v7" in dk:
        budget = 24 * 1024 * 1024                      # fits v7x 32 MiB scoped default
    else:
        budget = 8 * 1024 * 1024                       # v5e (16 MiB scoped) / unknown

    # Bytes per (batch, seq-row): x in + out, double-buffered (+ bits when training).
    per_bs_row = D * (4 * itemsize + (8 if use_dropout else 0))
    pe_row = 2 * D * itemsize                          # pe double-buffered

    def fits(ts, tb):
        return tb * ts * per_bs_row + ts * pe_row <= budget

    if fits(S, 1):
        TS = S
    else:
        TS = budget // (per_bs_row + pe_row)
        TS = max(sublane, (TS // sublane) * sublane)
        TS = min(TS, S)

    # Fold batch only when the whole sequence fits one tile (contiguous DMA).
    TB = 1
    if TS == S:
        avail = budget - TS * pe_row
        TB = int(max(1, min(B, avail // max(1, TS * per_bs_row))))

    # Keep >=2 parallel grid steps when possible (feeds both v7x TensorCores).
    n_steps = (-(-S // TS)) * (-(-B // TB))
    if n_steps < 2:
        if B >= 2:
            TB = (B + 1) // 2
        elif S >= 2 * sublane:
            TS = max(sublane, ((S // 2) // sublane) * sublane)

    return TS, TB


def _block_spec(block, index_map, deep):
    if deep is not None:
        return pl.BlockSpec(block, index_map, pipeline_mode=deep)
    return pl.BlockSpec(block, index_map)


# ---------------------------------------------------------------------------
# Wrapper
# ---------------------------------------------------------------------------
def positional_encoding(x, *, dropout_p: float = 0.1, training: bool = False, seed: int = 0):
    """x: (batch, seq, d_model). Returns dropout(x + PE[:seq]) (dropout only in training)."""
    B, S, D = x.shape
    use_dropout = training and dropout_p > 0.0
    if training and dropout_p >= 1.0:                  # degenerate case: drop everything
        return jnp.zeros_like(x)

    pe = _pe_table(S, D).astype(x.dtype)

    itemsize = jnp.dtype(x.dtype).itemsize
    device_kind = jax.devices()[0].device_kind
    TS, TB = _choose_tiles(B, S, D, itemsize, use_dropout, device_kind)
    n_s = -(-S // TS)
    n_b = -(-B // TB)
    grid = (n_s, n_b)        # seq tiles outer, batch inner -> PE tile stays resident

    # Deeper pipelining only on v7x and only when there are enough steps to hide.
    deep = pl.Buffered(3) if ("v7" in device_kind.lower() and n_s * n_b >= 4) else None

    x_spec = _block_spec((TB, TS, D), lambda s, b: (b, s, 0), deep)
    pe_spec = pl.BlockSpec((TS, D), lambda s, b: (s, 0))
    out_spec = pl.BlockSpec((TB, TS, D), lambda s, b: (b, s, 0))

    in_specs = [x_spec, pe_spec]
    inputs = [x, pe]
    if use_dropout:
        # TODO(synk): on real TPU an in-kernel pltpu.prng_random_bits mask would
        # save one HBM pass, but it has no interpret-mode lowering and ties the
        # mask to the tiling; bits are generated once in plain JAX instead.
        bits = jax.random.bits(jax.random.PRNGKey(seed), (B, S, D), dtype=jnp.uint32)
        in_specs.append(_block_spec((TB, TS, D), lambda s, b: (b, s, 0), deep))
        inputs.append(bits)

    kernel = _make_kernel(use_dropout, dropout_p)

    return pl.pallas_call(
        kernel,
        out_shape=jax.ShapeDtypeStruct((B, S, D), x.dtype),
        grid=grid,
        in_specs=in_specs,
        out_specs=out_spec,
        compiler_params=pltpu.CompilerParams(
            dimension_semantics=("parallel", "parallel"),
        ),
    )(*inputs)


# ---------------------------------------------------------------------------
# Pure-JAX reference (PyTorch buffer construction + add, eval mode).
# ---------------------------------------------------------------------------
def _reference(x, d_model):
    S = x.shape[1]
    position = jnp.arange(0.0, S, dtype=jnp.float32)[:, None]
    div_term = jnp.exp(jnp.arange(0.0, d_model, 2, dtype=jnp.float32)
                       * -(math.log(10000.0) / d_model))
    pe = jnp.zeros((S, d_model), dtype=jnp.float32)
    pe = pe.at[:, 0::2].set(jnp.sin(position * div_term))
    pe = pe.at[:, 1::2].set(jnp.cos(position * div_term))
    return x + pe[None, :, :]


if __name__ == "__main__":
    # ---- Eval-mode correctness (dropout is identity in eval, as nn.Dropout.eval()) ----
    B, S, D = 2, 8, 32
    x = jax.random.normal(jax.random.PRNGKey(0), (B, S, D), dtype=jnp.float32)

    out = jax.block_until_ready(positional_encoding(x, dropout_p=0.1, training=False))
    ref = _reference(x, D)
    assert out.shape == (B, S, D) and out.dtype == x.dtype
    assert jnp.allclose(out, ref, atol=1e-5, rtol=1e-5), "eval mismatch vs reference"

    # ---- Training-mode dropout: statistical + value check ----
    # (Mask cannot be bitwise-identical to torch's RNG; semantics -- inverted
    #  dropout with probability p -- match.)
    B2, S2, D2 = 4, 64, 128
    p = 0.5
    x_tr = jax.random.normal(jax.random.PRNGKey(1), (B2, S2, D2), dtype=jnp.float32)
    out_tr = jax.block_until_ready(
        positional_encoding(x_tr, dropout_p=p, training=True, seed=123))
    base = _reference(x_tr, D2)

    kept = out_tr != 0.0
    keep_frac = float(jnp.mean(kept.astype(jnp.float32)))
    assert abs(keep_frac - (1.0 - p)) < 0.05, f"keep fraction {keep_frac} far from {1 - p}"

    scaled = base / (1.0 - p)
    max_err = float(jnp.max(jnp.where(kept, jnp.abs(out_tr - scaled), 0.0)))
    assert max_err < 1e-4, f"kept values not scaled by 1/(1-p): max err {max_err}"

    print("KERNEL_OK")
</pallas_src>

<mosaic_0001>
module attributes {stable_mosaic.version = 11 : i64} {
  func.func @kernel(%arg0: i32, %arg1: i32, %arg2: memref<1x8x32xf32, #tpu.memory_space<vmem>>, %arg3: memref<8x32xf32, #tpu.memory_space<vmem>>, %arg4: memref<1x8x32xf32, #tpu.memory_space<vmem>>) attributes {dimension_semantics = [#tpu.dimension_semantics<parallel>, #tpu.dimension_semantics<parallel>], iteration_bounds = array<i64: 1, 2>, scalar_prefetch = 0 : i64, scratch_operands = 0 : i64, tpu.core_type = #tpu.core_type<tc>, window_params = [{transform_indices = @transform_0, window_bounds = array<i64: 1, 8, 32>}, {transform_indices = @transform_1, window_bounds = array<i64: 8, 32>}, {transform_indices = @transform_2, window_bounds = array<i64: 1, 8, 32>}]} {
    %c0 = arith.constant 0 : index
    %c0_0 = arith.constant 0 : index
    %c0_1 = arith.constant 0 : index
    %0 = vector.load %arg2[%c0, %c0_0, %c0_1] : memref<1x8x32xf32, #tpu.memory_space<vmem>>, vector<1x8x32xf32>
    %c0_2 = arith.constant 0 : index
    %c0_3 = arith.constant 0 : index
    %1 = vector.load %arg3[%c0_2, %c0_3] : memref<8x32xf32, #tpu.memory_space<vmem>>, vector<8x32xf32>
    %2 = vector.shape_cast %1 : vector<8x32xf32> to vector<1x8x32xf32>
    %3 = arith.addf %0, %2 : vector<1x8x32xf32>
    %c0_4 = arith.constant 0 : index
    %c0_5 = arith.constant 0 : index
    %c0_6 = arith.constant 0 : index
    %4 = vector.load %arg4[%c0_4, %c0_5, %c0_6] : memref<1x8x32xf32, #tpu.memory_space<vmem>>, vector<1x8x32xf32>
    tpu.vector_store %arg4[%c0_4, %c0_5, %c0_6], %3 {strides = array<i32>} : memref<1x8x32xf32, #tpu.memory_space<vmem>>, vector<1x8x32xf32>,
    return
  }
  func.func @transform_0(%arg0: i32, %arg1: i32) -> (i32, i32, i32) {
    %c0_i32 = arith.constant 0 : i32
    %c0_i32_0 = arith.constant 0 : i32
    return %arg1, %arg0, %c0_i32 : i32, i32, i32
  }
  func.func @transform_1(%arg0: i32, %arg1: i32) -> (i32, i32) {
    %c0_i32 = arith.constant 0 : i32
    %c0_i32_0 = arith.constant 0 : i32
    return %arg0, %c0_i32 : i32, i32
  }
  func.func @transform_2(%arg0: i32, %arg1: i32) -> (i32, i32, i32) {
    %c0_i32 = arith.constant 0 : i32
    %c0_i32_0 = arith.constant 0 : i32
    return %arg1, %arg0, %c0_i32 : i32, i32, i32
  }
}

</mosaic_0001>

<bundles_post_ra>
// kernel: tpu_custom_call.1
= control target key start
LH: loop header
LB: loop body
LE: loop exit
PB: predicated region body
PF: predicated region fallthrough
CT: control target
= control target key end

     0   :  { %7 = vsyncpa [#allocation3], 0  ;;  %s715_s0 = inlined_call_operand.hbm [shape: f32[2,8,32], index: 0, kind: input, shape index: {}]   ;;  %s716_s1 = inlined_call_operand.hbm [shape: f32[8,32], index: 1, kind: input, shape index: {}]   ;;  %s717_s2 = inlined_call_operand.hbm [shape: f32[2,8,32], index: 2, kind: output, shape index: {}]  }
   0x1   :  { %9 = vsyncpa [#allocation3 + $0x1], 0 }
   0x2   :  { %10 = vsyncpa [#allocation6], 0 }
   0x3   :  { %11 = vsyncpa [#allocation4], 0 }
   0x4   :  { %13 = vsyncpa [#allocation4 + $0x1], 0  ;;  %s554_s9 = smov 0   ;;  %s556_s10 = smov 0  }
   0x5   :  { %s558_s11 = smov 0   ;;  %s560_s12 = smov 0  }
   0x6   :  { %s562_s13 = smov 0   ;;  %s564_s14 = smov 0  }
   0x7 LB: > { %s308_s15 = sadd.s32 4294967295, %s534_s14   ;;  %s309_s16 = sadd.s32 4294967294, %s534_s14   ;;  %s534_s14 = sphi %s564_s14, %s19_s14   ;;  %s530_s13 = sphi %s562_s13, %s734_s13   ;;  %s526_s12 = sphi %s560_s12, %s733_s12   ;;  %s522_s11 = sphi %s558_s11, %s732_s11   ;;  %s518_s10 = sphi %s556_s10, %s731_s10   ;;  %s514_s9 = sphi %s554_s9, %s730_s9  }
   0x8   : > { %p53_p0 = scmp.ne.s32.totalorder %s518_s10, %s514_s9  ;;  %p588_p1 = scmp.eq.s32.totalorder %s308_s15, 0 }
   0x9   : > { %p592_p2 = scmp.eq.s32.totalorder %s308_s15, 1  ;;  %p111_p3 = scmp.eq.s32.totalorder %s309_s16, 1 }
   0xa   : > { %p598_p4 = por %p588_p1, %p53_p0  ;;  %p310_p5 = scmp.ge.s32.totalorder %s534_s14, 1 }
   0xb   : > { %p603_p6 = por %p111_p3, %p53_p0  ;;  %p118_p7 = scmp.lt.s32.totalorder %s534_s14, 3 }
   0xc   : > { %s721_s19 = scalar_select %p598_p4, 1, 0 }
   0xd   : > { %s722_s20 = scalar_select %p603_p6, 1, 0 }
   0xe   : > { %p608_p8 = pnand %p310_p5, %p118_p7  ;;  %s536_s22 = smov [#allocation5]  }
   0xf   : > { %s133_s23 = sshll.u32 %s536_s22, 4  ;;  %s28_s25 = sadd.s32 1, %s530_s13  ;;  %s134_s23 = int_to_ptr.vmem [resolvable:$true] %s133_s23 }
  0x10   : > { %p331_p10 = pneg %p608_p8  ;;  %s40_s26 = sadd.s32 1, %s522_s11 }
  0x11   : > { %p29_p12 = scmp.ge.s32.totalorder %s28_s25, 2  ;;  %s407_s27 = scalar_lea.vmem %s134_s23, 128 }
  0x12   : > { %p617_p11 = pnand %p331_p10, %p588_p1  ;;  %p408_p0 = scmp.ne.s32.totalorder %s134_s23, %s407_s27 }
  0x13   : > { %p415_p7 = scmp.lt.s32.totalorder %s134_s23, %s134_s23  ;;  %p416_p6 = scmp.lt.s32.totalorder %s407_s27, %s407_s27 }
  0x14   : > { %p398_p13 = pneg %p617_p11 }
  0x15   : > { %p417_p9 = por %p416_p6, %p415_p7 }
  0x16   : > { %p410_p3 = pnand %p408_p0, %p398_p13 }
  0x18   : > { %p411_p5 = pneg %p410_p3 }
  0x1a   : > { %p418_p4 = pnand %p417_p9, %p411_p5 }
  0x1c   : > { %421 = shalt.err (!%p418_p4)
}
  0x1d   : > { %334 = dma.hbm_to_vmem [thread:$0]  (!%p617_p11), %s716_s1, 128, %s134_s23, [#allocation6]  }
  0x1e   : > { %s736_s25 = smov (%p29_p12, %s28_s25), 0  ;;  %p47_p6 = scmp.ne.s32.totalorder %s522_s11, %s518_s10 }
  0x1f   : > { %p48_p4 = scmp.eq.s32.totalorder %s534_s14, 0  ;;  %s35_s30 = ssub.s32 %s530_s13, %s736_s25 }
  0x20   : > { %p344_p9 = scmp.lt.s32.totalorder %s534_s14, 2  ;;  %p38_p10 = scmp.eq.s32.totalorder %s35_s30, 0 }
  0x21   : > { %p49_p13 = por %p48_p4, %p47_p6  ;;  %p640_p0 = por %p592_p2, %p47_p6 }
  0x22   : > { %s144_s4 = sand.u32 1, %s522_s11   ;;  %s314_s7 = sshll.u32 %s530_s13, 7 }
  0x23   : > { %s646_s5 = scalar_select %p38_p10, %s522_s11, %s40_s26  }
  0x24   : > { %s313_s6 = sshll.u32 %s144_s4, 3  ;;  %s154_s16 = scalar_lea.hbm %s715_s0, %s314_s7 }
  0x25   : > { %s148_s22 = scalar_lea.vmem [#allocation2], %s313_s6  ;;  %p652_p11 = pnand %p344_p9, %p49_p13 }
  0x26   : > { %s156_s23 = sshll.u32 %s148_s22, 4  ;;  %s145_s18 = scalar_lea.sflag [#allocation3], %s144_s4  ;;  %s157_s23 = int_to_ptr.vmem [resolvable:$true] %s156_s23 }
  0x27   : > { %p424_p2 = pneg %p652_p11  ;;  %s435_s27 = scalar_lea.vmem %s157_s23, 128 }
  0x28   : > { %p436_p12 = scmp.ne.s32.totalorder %s157_s23, %s435_s27  ;;  %s537_s26 = smov [#allocation2]  }
  0x29   : > { %s440_s28 = sshll.u32 %s537_s26, 4  ;;  %s441_s28 = int_to_ptr.vmem [resolvable:$false] %s440_s28 }
  0x2a   : > { %p438_p3 = pnand %p436_p12, %p424_p2  ;;  %s442_s29 = scalar_lea.vmem %s441_s28, 256 }
  0x2b   : > { %p443_p7 = scmp.lt.s32.totalorder %s157_s23, %s441_s28  ;;  %p444_p6 = scmp.lt.s32.totalorder %s442_s29, %s435_s27 }
  0x2c   : > { %p439_p5 = pneg %p438_p3 }
  0x2d   : > { %p445_p4 = por %p444_p6, %p443_p7 }
  0x2f   : > { %p446_p10 = pnand %p445_p4, %p439_p5 }
  0x31   : > { %449 = shalt.err (!%p446_p10)
}
  0x32   : > { %338 = dma.hbm_to_vmem [thread:$0]  (!%p652_p11), %s154_s16, 128, %s157_s23, %s145_s18  }
  0x33   : > { %165 = sbr.rel (%p608_p8) target bundleno = 83 (0x53), region = 28  ;;  %s663_s30 = sand.u32 (!%p608_p8), 1, %s518_s10  }
  0x34   : > { %s316_s4 = sshll.u32 (!%p608_p8), %s663_s30, 3  ;;  %s168_s6 = scalar_lea.sflag (!%p608_p8), [#allocation3], %s663_s30 }
  0x35   : > { %s171_s7 = scalar_lea.vmem (!%p608_p8), [#allocation2], %s316_s4  ;;  %p727_p9 = scmp.ne.s32.totalorder (!%p608_p8), %s721_s19, 0 }
  0x38   : > { %501 = dma.done.wait (%p727_p9), %s168_s6, 128  }
  0x39   : > { %503 = vsyncadd (%p727_p9), %s168_s6, 4294967168 }
  0x3a   : > { %505 = dma.done.wait (%p588_p1), [#allocation6], 128  }
  0x3b   : > { %507 = vsyncadd (%p588_p1), [#allocation6], 4294967168  ;;  %s195_s21 = scalar_lea.vmem [#allocation7], %s316_s4  ;;  %s320_s15 = sshll.u32 %s526_s12, 7  ;;  %v196_v0 = vld [vmem:[%s171_s7] sm:$0xff]  ;;  %v197_v1 = vld [vmem:[#allocation5] sm:$0xff] }
  0x3c   : > { %s216_s8 = sshll.u32 %s195_s21, 4  ;;  %vm199_vm0 = vcmask 261120   ;;  %v198_v2 = vadd.f32 %v197_v1, %v196_v0  ;;  %s214_s22 = scalar_lea.hbm %s717_s2, %s320_s15  ;;  %s217_s8 = int_to_ptr.vmem [resolvable:$true] %s216_s8 }
  0x3d   : > { %s202_s23 = scalar_lea.sflag [#allocation4], %s663_s30  ;;  %s450_s24 = scalar_lea.vmem %s217_s8, 128 }
  0x3e   : > { %200 = vst.msk [vmem:[%s195_s21] sm:$0xff] %vm199_vm0, %v198_v2  ;;  %p451_p8 = scmp.ne.s32.totalorder %s217_s8, %s450_s24  ;;  %s538_s17 = smov [#allocation7]  }
  0x3f   : > { %s454_s18 = sshll.u32 %s538_s17, 4  ;;  %s455_s18 = int_to_ptr.vmem [resolvable:$false] %s454_s18 }
  0x40   : > { %p452_p1 = pnand %p451_p8, %p640_p0  ;;  %s456_s12 = scalar_lea.vmem %s455_s18, 256 }
  0x41   : > { %p457_p11 = scmp.lt.s32.totalorder %s217_s8, %s455_s18  ;;  %p458_p2 = scmp.lt.s32.totalorder %s456_s12, %s450_s24 }
  0x42   : > { %p453_p13 = pneg %p452_p1 }
  0x43   : > { %p459_p12 = por %p458_p2, %p457_p11 }
  0x45   : > { %p460_p3 = pnand %p459_p12, %p453_p13 }
  0x47   : > { %463 = shalt.err (!%p460_p3)
}
  0x48   : > { %s464_s27 = scalar_lea.hbm %s214_s22, 128  ;;  %s468_s29 = scalar_lea.hbm %s717_s2, 256 }
  0x49   : > { %p465_p5 = scmp.ne.s32.totalorder %s214_s22, %s464_s27  ;;  %p469_p4 = scmp.lt.s32.totalorder %s214_s22, %s717_s2 }
  0x4a   : > { %p470_p10 = scmp.lt.s32.totalorder %s468_s29, %s464_s27 }
  0x4b   : > { %p466_p7 = pnand %p465_p5, %p640_p0 }
  0x4c   : > { %p471_p9 = por %p470_p10, %p469_p4 }
  0x4d   : > { %p467_p6 = pneg %p466_p7 }
  0x4f   : > { %p472_p8 = pnand %p471_p9, %p467_p6 }
  0x51   : > { %475 = shalt.err (!%p472_p8)
}
  0x52   : > { %329 = dma.vmem_to_hbm [thread:$0]  (%p640_p0), %s217_s8, 128, %s214_s22, %s202_s23  }
  0x53 PF: > { %s228_s6 = sand.u32 1, %s514_s9   ;;  %p728_p1 = scmp.ne.s32.totalorder %s722_s20, 0 }
  0x54   : > { %p729_p13 = scmp.ge.s32.totalorder %s534_s14, 2  ;;  %s229_s7 = scalar_lea.sflag [#allocation4], %s228_s6 }
  0x56   : > { %p340_p11 = pnand %p729_p13, %p728_p1 }
  0x58   : > { %p341_p2 = pneg %p340_p11 }
  0x5a   : > { %509 = dma.done.wait (%p341_p2), %s229_s7, 128  }
  0x5b   : > { %511 = vsyncadd (%p341_p2), %s229_s7, 4294967168  ;;  %s19_s14 = sadd.s32 1, %s534_s14   ;;  %s730_s9 = smov %s518_s10 }
  0x5c   : > { %p16_p12 = scmp.ge.s32.totalorder %s19_s14, 4   ;;  %s731_s10 = smov %s522_s11 }
  0x5d   : > { %s732_s11 = smov %s646_s5  ;;  %s733_s12 = smov %s530_s13 }
  0x5e   : > { %s734_s13 = smov %s736_s25  ;;  %18 = sbr.rel (!%p16_p12) target bundleno = 7 (0x7), region = 78 }
  0x63   :  { %234 = vsyncpa [#allocation3], 1 }
  0x64   :  { %236 = vsyncpa [#allocation3 + $0x1], 1 }
  0x65   :  { %237 = vsyncpa [#allocation6], 1 }
  0x66   :  { %238 = vsyncpa [#allocation4], 1 }
  0x67   :  { %240 = vsyncpa [#allocation4 + $0x1], 1 }

</bundles_post_ra>
